<compile_context>
chip_gen: v7x
topology: tpu7x:2x2x1
jax: 0.10.0
libtpu: 0.0.40
codegen_flags: <defaults>
</compile_context>

<pallas_src>
import functools

import jax
import jax.numpy as jnp
from jax import lax
from jax.experimental import pallas as pl
from jax.experimental.pallas import tpu as pltpu

_LANE = 128


def se_block_kernel(x_ref, w1_ref, w2_ref, o_ref, *, inv_hw):
    # x_ref:  (Bt, C, HW)   per-block slab, HW is the TRUE spatial size
    # w1_ref: (Cr, C)       PyTorch Linear(C, Cr, bias=False) weight
    # w2_ref: (C, Cr)       PyTorch Linear(Cr, C, bias=False) weight
    # o_ref:  (Bt, C, HW)
    #
    # NOTE: with a partial last batch block (grid = cdiv(B, bt)), the trailing
    # batch rows hold garbage; every stage below is independent per batch row
    # (pool over lanes, matmuls contract over channels), and out-of-bounds
    # output rows are dropped by the masked store, so garbage never leaks.

    # Squeeze: f32-accumulated mean over the spatial (lane) axis.  No padding,
    # so dividing by the true HW is exact and no tail mask is needed.
    pooled = jnp.sum(x_ref[...], axis=-1, dtype=jnp.float32) * inv_hw       # (Bt, C)

    # Excitation: tiny MXU matmuls, contracting the input-feature axes so the
    # PyTorch (out, in) weights are used untransposed (y @ W.T).  Weights stay
    # in their native dtype (native bf16 MXU path when applicable); the MXU
    # accumulates in f32 via preferred_element_type.
    w1 = w1_ref[...]
    h = lax.dot_general(pooled.astype(w1.dtype), w1,
                        (((1,), (1,)), ((), ())),
                        preferred_element_type=jnp.float32)                 # (Bt, Cr)
    h = jnp.maximum(h, 0.0)
    w2 = w2_ref[...]
    s = lax.dot_general(h.astype(w2.dtype), w2,
                        (((1,), (1,)), ((), ())),
                        preferred_element_type=jnp.float32)                 # (Bt, C)
    s = jax.nn.sigmoid(s)

    # Scale: re-read x_ref and multiply in the native dtype; the gate broadcasts
    # across the spatial (lane) axis.
    o_ref[...] = x_ref[...] * s.astype(o_ref.dtype)[:, :, None]


def _round_up(x, m):
    return (x + m - 1) // m * m


def _vmem_capacity_bytes():
    try:
        return int(pltpu.get_tpu_info().vmem_capacity_bytes)
    except Exception:
        return 64 << 20  # conservative default (v7x-sized VMEM)


def _pick_batch_tile(batch, vmem_bytes_per_batch, target_bytes):
    """Batch elements per block: as many as fit in target_bytes, while keeping
    at least two grid steps when batch >= 2 (so both v7x TensorCores get work).
    bt does NOT need to divide batch; the grid uses cdiv with a partial block."""
    if batch <= 1:
        return 1
    by_bytes = max(1, target_bytes // max(1, vmem_bytes_per_batch))
    by_grid = -(-batch // 2)  # ceil(batch / 2) -> at least 2 grid steps
    return int(max(1, min(by_bytes, by_grid)))


def se_block(x_nchw, w1, w2):
    """x_nchw: (B, C, H, W); w1: (C//r, C); w2: (C, C//r). Returns (B, C, H, W)."""
    B, C, H, W = x_nchw.shape
    Cr = w1.shape[0]
    HW = H * W
    dsize = jnp.dtype(x_nchw.dtype).itemsize
    w_dsize = jnp.dtype(w1.dtype).itemsize

    # Free metadata reshape: lane axis is the full HW (no padding, no copies).
    x_flat = x_nchw.reshape(B, C, HW)

    # VMEM footprint of one batch element's (C, HW) slab, accounting for the
    # hardware (sublane, lane) tiling pad.
    sublane = 8 * max(1, 4 // dsize)
    per_batch_vmem = _round_up(C, sublane) * _round_up(HW, _LANE) * dsize

    # Block-size target scaled to the chip: ~8 MiB on 128 MiB-VMEM parts
    # (v5e/v6e), ~4 MiB on v7x (64 MiB VMEM).
    vmem_cap = _vmem_capacity_bytes()
    target_bytes = min(8 << 20, vmem_cap // 16)
    bt = _pick_batch_tile(B, per_batch_vmem, target_bytes)
    num_blocks = pl.cdiv(B, bt)

    # Scoped-VMEM limit: double-buffered input + output blocks, double-buffered
    # (tiny, resident) weights, plus margin for compiler-internal scratch.
    w_sublane = 8 * max(1, 4 // w_dsize)
    w_vmem = (_round_up(Cr, w_sublane) * _round_up(C, _LANE)
              + _round_up(C, w_sublane) * _round_up(Cr, _LANE)) * w_dsize
    need = 4 * bt * per_batch_vmem + 2 * w_vmem + (2 << 20)
    vmem_limit = int(min(max(need, 32 << 20), (vmem_cap * 3) // 4))

    # TODO(synk): if a single (C, HW) slab is so large that 4x block exceeds the
    # VMEM budget (huge early-layer maps, esp. on v7x), split into a
    # pool+excitation kernel plus a separate lane-dense scale kernel.
    # TODO(synk): when B == 1 the batch-only grid leaves one v7x TensorCore
    # idle; a two-kernel split with an HW-tiled parallel axis would fix that.

    kernel = functools.partial(se_block_kernel, inv_hw=1.0 / HW)
    cost = pl.CostEstimate(
        flops=int(2 * B * C * HW + 4 * B * C * Cr),
        transcendentals=int(B * C),
        bytes_accessed=int(2 * B * C * HW * dsize
                           + (w1.size + w2.size) * w_dsize),
    )

    out_flat = pl.pallas_call(
        kernel,
        out_shape=jax.ShapeDtypeStruct((B, C, HW), x_nchw.dtype),
        grid_spec=pltpu.PrefetchScalarGridSpec(
            num_scalar_prefetch=0,
            grid=(num_blocks,),
            in_specs=[
                # Last two block dims equal the full array dims -> legal even
                # when C % 8 != 0 or HW % 128 != 0 (masked tail vregs only).
                pl.BlockSpec((bt, C, HW), lambda b: (b, 0, 0)),  # batch-tile slab
                pl.BlockSpec((Cr, C), lambda b: (0, 0)),         # resident weight
                pl.BlockSpec((C, Cr), lambda b: (0, 0)),         # resident weight
            ],
            out_specs=pl.BlockSpec((bt, C, HW), lambda b: (b, 0, 0)),
        ),
        compiler_params=pltpu.CompilerParams(
            dimension_semantics=("parallel",),
            vmem_limit_bytes=vmem_limit,
        ),
        cost_estimate=cost,
    )(x_flat, w1, w2)

    return out_flat.reshape(B, C, H, W)


def _reference(x, w1, w2):
    y = jnp.mean(x, axis=(2, 3))                    # (B, C)
    y = jnp.maximum(y @ w1.T, 0.0)                  # (B, Cr)
    y = jax.nn.sigmoid(y @ w2.T)                    # (B, C)
    return x * y[:, :, None, None]


if __name__ == "__main__":
    # Small shapes consistent with the module (reduction=16 needs C >= 16).
    B, C, H, W = 4, 64, 16, 16
    reduction = 16
    Cr = C // reduction

    key = jax.random.PRNGKey(0)
    kx, kw1, kw2 = jax.random.split(key, 3)
    x = jax.random.normal(kx, (B, C, H, W), dtype=jnp.float32)
    # PyTorch Linear weight shapes: (out_features, in_features).
    w1 = jax.random.normal(kw1, (Cr, C), dtype=jnp.float32) * 0.1   # Linear(C, Cr)
    w2 = jax.random.normal(kw2, (C, Cr), dtype=jnp.float32) * 0.1   # Linear(Cr, C)

    out = jax.block_until_ready(se_block(x, w1, w2))
    ref = _reference(x, w1, w2)
    assert jnp.allclose(out, ref, atol=1e-5, rtol=1e-5), "mismatch vs reference"

    # Exercise HW % 128 != 0 (7x7 maps) AND a partial last batch block (B=3
    # with bt=2 -> grid = cdiv(3, 2) = 2, last block masked).
    x2 = jax.random.normal(kx, (3, C, 7, 7), dtype=jnp.float32)
    out2 = jax.block_until_ready(se_block(x2, w1, w2))
    ref2 = _reference(x2, w1, w2)
    assert jnp.allclose(out2, ref2, atol=1e-5, rtol=1e-5), "mismatch (7x7 / partial block)"

    print("KERNEL_OK")
</pallas_src>

<mosaic_0001>
module attributes {stable_mosaic.version = 11 : i64} {
  func.func @se_block_kernel(%arg0: i32, %arg1: memref<2x64x256xf32, #tpu.memory_space<vmem>>, %arg2: memref<4x64xf32, #tpu.memory_space<vmem>>, %arg3: memref<64x4xf32, #tpu.memory_space<vmem>>, %arg4: memref<2x64x256xf32, #tpu.memory_space<vmem>>) attributes {dimension_semantics = [#tpu.dimension_semantics<parallel>], iteration_bounds = array<i64: 2>, scalar_prefetch = 0 : i64, scratch_operands = 0 : i64, tpu.core_type = #tpu.core_type<tc>, window_params = [{transform_indices = @transform_0, window_bounds = array<i64: 2, 64, 256>}, {pipeline_mode = #tpu.pipeline_mode<synchronous>, transform_indices = @transform_1, window_bounds = array<i64: 4, 64>}, {pipeline_mode = #tpu.pipeline_mode<synchronous>, transform_indices = @transform_2, window_bounds = array<i64: 64, 4>}, {transform_indices = @transform_3, window_bounds = array<i64: 2, 64, 256>}]} {
    %c0 = arith.constant 0 : index
    %c0_0 = arith.constant 0 : index
    %c0_1 = arith.constant 0 : index
    %0 = vector.load %arg1[%c0, %c0_0, %c0_1] : memref<2x64x256xf32, #tpu.memory_space<vmem>>, vector<2x64x256xf32>
    %cst = arith.constant dense<0.000000e+00> : vector<2x64xf32>
    %1 = vector.multi_reduction <add>, %0, %cst [2] : vector<2x64x256xf32> to vector<2x64xf32>
    %cst_2 = arith.constant 3.906250e-03 : f32
    %2 = vector.broadcast %cst_2 : f32 to vector<2x64xf32>
    %3 = arith.mulf %1, %2 : vector<2x64xf32>
    %c0_3 = arith.constant 0 : index
    %c0_4 = arith.constant 0 : index
    %4 = vector.load %arg2[%c0_3, %c0_4] : memref<4x64xf32, #tpu.memory_space<vmem>>, vector<4x64xf32>
    %cst_5 = arith.constant dense<0.000000e+00> : vector<2x4xf32>
    %5 = tpu.matmul %3, %4, %cst_5 {dimension_numbers = #tpu.dot_dimension_numbers<[1], [1], [0], [0], [0, 0, 1, 0], [], []>} : vector<2x64xf32>, vector<4x64xf32>, vector<2x4xf32> -> vector<2x4xf32>
    %cst_6 = arith.constant 0.000000e+00 : f32
    %6 = vector.broadcast %cst_6 : f32 to vector<2x4xf32>
    %7 = arith.maximumf %5, %6 : vector<2x4xf32>
    %c0_7 = arith.constant 0 : index
    %c0_8 = arith.constant 0 : index
    %8 = vector.load %arg3[%c0_7, %c0_8] : memref<64x4xf32, #tpu.memory_space<vmem>>, vector<64x4xf32>
    %cst_9 = arith.constant dense<0.000000e+00> : vector<2x64xf32>
    %9 = tpu.matmul %7, %8, %cst_9 {dimension_numbers = #tpu.dot_dimension_numbers<[1], [1], [0], [0], [0, 0, 1, 0], [], []>} : vector<2x4xf32>, vector<64x4xf32>, vector<2x64xf32> -> vector<2x64xf32>
    %10 = arith.negf %9 : vector<2x64xf32>
    %11 = math.exp %10 : vector<2x64xf32>
    %cst_10 = arith.constant 1.000000e+00 : f32
    %12 = vector.broadcast %cst_10 : f32 to vector<2x64xf32>
    %13 = arith.addf %12, %11 : vector<2x64xf32>
    %14 = arith.divf %12, %13 : vector<2x64xf32>
    %c0_11 = arith.constant 0 : index
    %c0_12 = arith.constant 0 : index
    %c0_13 = arith.constant 0 : index
    %15 = vector.load %arg1[%c0_11, %c0_12, %c0_13] : memref<2x64x256xf32, #tpu.memory_space<vmem>>, vector<2x64x256xf32>
    %16 = vector.shape_cast %14 : vector<2x64xf32> to vector<2x64x1xf32>
    %17 = vector.broadcast %16 : vector<2x64x1xf32> to vector<2x64x256xf32>
    %18 = arith.mulf %15, %17 : vector<2x64x256xf32>
    %c0_14 = arith.constant 0 : index
    %c0_15 = arith.constant 0 : index
    %c0_16 = arith.constant 0 : index
    %19 = vector.load %arg4[%c0_14, %c0_15, %c0_16] : memref<2x64x256xf32, #tpu.memory_space<vmem>>, vector<2x64x256xf32>
    tpu.vector_store %arg4[%c0_14, %c0_15, %c0_16], %18 {strides = array<i32>} : memref<2x64x256xf32, #tpu.memory_space<vmem>>, vector<2x64x256xf32>,
    return
  }
  func.func @transform_0(%arg0: i32) -> (i32, i32, i32) {
    %c0_i32 = arith.constant 0 : i32
    %c0_i32_0 = arith.constant 0 : i32
    %c0_i32_1 = arith.constant 0 : i32
    return %arg0, %c0_i32, %c0_i32_0 : i32, i32, i32
  }
  func.func @transform_1(%arg0: i32) -> (i32, i32) {
    %c0_i32 = arith.constant 0 : i32
    %c0_i32_0 = arith.constant 0 : i32
    %c0_i32_1 = arith.constant 0 : i32
    return %c0_i32, %c0_i32_0 : i32, i32
  }
  func.func @transform_2(%arg0: i32) -> (i32, i32) {
    %c0_i32 = arith.constant 0 : i32
    %c0_i32_0 = arith.constant 0 : i32
    %c0_i32_1 = arith.constant 0 : i32
    return %c0_i32, %c0_i32_0 : i32, i32
  }
  func.func @transform_3(%arg0: i32) -> (i32, i32, i32) {
    %c0_i32 = arith.constant 0 : i32
    %c0_i32_0 = arith.constant 0 : i32
    %c0_i32_1 = arith.constant 0 : i32
    return %arg0, %c0_i32, %c0_i32_0 : i32, i32, i32
  }
}

</mosaic_0001>

<bundles_post_ra>
// kernel: tpu_custom_call.1
= control target key start
LH: loop header
LB: loop body
LE: loop exit
PB: predicated region body
PF: predicated region fallthrough
CT: control target
= control target key end

     0   :  { %8 = vsyncpa [#allocation3], 0  ;;  %s1510_s0 = inlined_call_operand.hbm [shape: f32[4,64,256], index: 0, kind: input, shape index: {}]   ;;  %s1511_s1 = inlined_call_operand.vmem [shape: f32[4,64], index: 1, kind: input, shape index: {}]   ;;  %s1512_s2 = inlined_call_operand.vmem [shape: f32[64,4], index: 2, kind: input, shape index: {}]   ;;  %s1513_s3 = inlined_call_operand.hbm [shape: f32[4,64,256], index: 3, kind: output, shape index: {}]  }
   0x1   :  { %10 = vsyncpa [#allocation3 + $0x1], 0 }
   0x2   :  { %11 = vsyncpa [#allocation4], 0 }
   0x3   :  { %13 = vsyncpa [#allocation4 + $0x1], 0  ;;  %s1079_s12 = smov 0   ;;  %s1081_s13 = smov 0  }
   0x4   :  { %s1083_s14 = smov 0   ;;  %s1085_s15 = smov 0  }
   0x5 LB: > { %s1100_s16 = sadd.s32 4294967295, %s1048_s15   ;;  %s812_s17 = sadd.s32 4294967294, %s1048_s15   ;;  %s1048_s15 = sphi %s1085_s15, %s1549_s15   ;;  %s1044_s14 = sphi %s1083_s14, %s1548_s14   ;;  %s1040_s13 = sphi %s1081_s13, %s1547_s13   ;;  %s1036_s12 = sphi %s1079_s12, %s1546_s12  }
   0x6   : > { %s1104_s18 = sadd.s32 1, %s1048_s15   ;;  %s26_s19 = sadd.s32 1, %s1044_s14 }
   0x7   : > { %s23_s20 = ssub.s32 %s1048_s15, %s1104_s18  ;;  %p33_p0 = scmp.ne.s32.totalorder %s1044_s14, %s1040_s13 }
   0x8   : > { %p24_p1 = scmp.eq.s32.totalorder %s23_s20, 0  ;;  %p34_p2 = scmp.eq.s32.totalorder %s1048_s15, 0 }
   0x9   : > { %p39_p3 = scmp.ne.s32.totalorder %s1040_s13, %s1036_s12  ;;  %p40_p4 = scmp.eq.s32.totalorder %s1100_s16, 0 }
   0xa   : > { %s1116_s21 = scalar_select %p24_p1, %s1044_s14, %s26_s19  }
   0xb   : > { %p1118_p5 = por %p34_p2, %p33_p0  ;;  %p1122_p6 = por %p40_p4, %p39_p3 }
   0xc   : > { %p105_p7 = scmp.eq.s32.totalorder %s1100_s16, 1  ;;  %p111_p8 = scmp.eq.s32.totalorder %s812_s17, 1 }
   0xd   : > { %p907_p10 = scmp.lt.s32.totalorder %s1048_s15, 2  ;;  %s137_s26 = sand.u32 1, %s1044_s14  }
   0xe   : > { %p1129_p11 = por %p105_p7, %p33_p0  ;;  %p1133_p12 = por %p111_p8, %p39_p3 }
   0xf   : > { %s841_s27 = sshll.u32 %s1048_s15, 12  ;;  %s815_s28 = sshll.u32 %s137_s26, 8 }
  0x10   : > { %s1524_s24 = scalar_select %p1129_p11, 1, 0 }
  0x11   : > { %s1525_s25 = scalar_select %p1133_p12, 1, 0 }
  0x12   : > { %s1142_s4 = scalar_lea.hbm %s1510_s0, %s841_s27  ;;  %s141_s5 = scalar_lea.vmem [#allocation2], %s815_s28 }
  0x13   : > { %s149_s6 = sshll.u32 %s141_s5, 4  ;;  %p1146_p13 = pnand %p907_p10, %p1118_p5  ;;  %s1150_s6 = int_to_ptr.vmem [resolvable:$true] %s149_s6 }
  0x14   : > { %s1152_s8 = scalar_lea.sflag [#allocation3], %s137_s26  ;;  %s952_s9 = scalar_lea.hbm %s1142_s4, 4096 }
  0x15   : > { %p953_p0 = scmp.ne.s32.totalorder %s1142_s4, %s952_s9  ;;  %p954_p1 = pneg %p1146_p13 }
  0x16   : > { %s957_s17 = scalar_lea.hbm %s1510_s0, 8192  ;;  %p958_p4 = scmp.lt.u32.totalorder %s1142_s4, %s1510_s0 }
  0x17   : > { %p955_p2 = pnand %p954_p1, %p953_p0  ;;  %p959_p5 = scmp.lt.u32.totalorder %s957_s17, %s952_s9 }
  0x18   : > { %p961_p8 = scmp.lt.u32.totalorder %s952_s9, %s1142_s4 }
  0x19   : > { %p956_p3 = pneg %p955_p2  ;;  %p960_p7 = por %p959_p5, %p958_p4 }
  0x1b   : > { %p962_p10 = por %p961_p8, %p960_p7 }
  0x1d   : > { %p963_p9 = pnand %p962_p10, %p956_p3 }
  0x1f   : > { %966 = shalt.err (!%p963_p9)
}
  0x20   : > { %s967_s22 = scalar_lea.vmem %s1150_s6, 4096  ;;  %s1050_s26 = smov [#allocation2]  }
  0x21   : > { %p968_p0 = scmp.ne.s32.totalorder %s1150_s6, %s967_s22  ;;  %s972_s27 = sshll.u32 %s1050_s26, 4  ;;  %s973_s27 = int_to_ptr.vmem [resolvable:$false] %s972_s27 }
  0x22   : > { %s974_s28 = scalar_lea.vmem %s973_s27, 8192  ;;  %p975_p11 = scmp.lt.s32.totalorder %s1150_s6, %s973_s27 }
  0x23   : > { %p970_p2 = pnand %p968_p0, %p954_p1  ;;  %p976_p4 = scmp.lt.s32.totalorder %s974_s28, %s967_s22 }
  0x25   : > { %p971_p12 = pneg %p970_p2  ;;  %p977_p5 = por %p976_p4, %p975_p11 }
  0x27   : > { %p978_p7 = pnand %p977_p5, %p971_p12 }
  0x29   : > { %981 = shalt.err (!%p978_p7)
}
  0x2a   : > { %s1051_s29 = smov 256   ;;  %s1052_s30 = smov 16  }
  0x2b   : > { %902 = dma.hbm_to_vmem [thread:$0]  (!%p1146_p13), %s1142_s4, 4096, %s1150_s6, %s1152_s8, %s1051_s29, %s1051_s29, %s1052_s30  }
  0x2c   : > { %p819_p9 = scmp.ge.s32.totalorder %s1048_s15, 1  ;;  %p157_p1 = scmp.lt.s32.totalorder %s1048_s15, 3 }
  0x2e   : > { %p158_p3 = pnand %p819_p9, %p157_p1 }
  0x30   : > { %161 = sbr.rel (%p158_p3) target bundleno = 857 (0x359), region = 32 }
  0x37   : > { %s1183_s5 = sand.u32 1, %s1040_s13  }
  0x38   : > { %s820_s9 = sshll.u32 %s1183_s5, 8  ;;  %s164_s10 = scalar_lea.sflag [#allocation3], %s1183_s5 }
  0x39   : > { %s1189_s11 = scalar_lea.vmem [#allocation2], %s820_s9 }
  0x3a   : > { %1027 = dma.done.wait (%p1122_p6), %s164_s10, 4096  }
  0x3b   : > { %1029 = vsyncadd (%p1122_p6), %s164_s10, 4294963200  ;;  %v1196_v0 = vld [vmem:[%s1189_s11 + $0x80] sm:$0xff]  ;;  %v1199_v1 = vld [vmem:[%s1189_s11 + $0x88] sm:$0xff]  ;;  %v1053_v48 = vmov 0.0   ;;  %vm401_vm0 = vcmask 523264   ;;  %vm1054_vm1 = vmmov 0  }
  0x3c   : > { %v1202_v2 = vld [vmem:[%s1189_s11] sm:$0xff]  ;;  %v248_v3 = vadd.f32 %v1199_v1, %v1196_v0  ;;  %v1207_v4 = vld [vmem:[%s1189_s11 + $0x8] sm:$0xff]  ;;  %v1210_v5 = vld [vmem:[%s1189_s11 + $0x90] sm:$0xff]  ;;  %855 = vmatprep.subr.mxu0 %v1053_v48  ;;  %857 = vmatprep.mubr.msk.f32.mxu0 %vm1054_vm1, %v1053_v48  ;;  %vm486_vm2 = vcmask 31744   ;;  %v1055_v52 = vmov 0.0|0.0   ;;  %vm316_vm4 = vcmask 130112  }
  0x3d   : > { %v1213_v6 = vld [vmem:[%s1189_s11 + $0x98] sm:$0xff]  ;;  %v224_v7 = vadd.f32 %v1207_v4, %v1202_v2  ;;  %v1218_v8 = vld [vmem:[%s1189_s11 + $0x10] sm:$0xff]  ;;  %v1228_v12 = vld [vmem:[%s1189_s11 + $0xa0] sm:$0xff]  ;;  %876 = vmatprep.mubr.msk.f32.mxu1 %vm1054_vm1, %v1053_v48  ;;  %879 = vmatprep.subr.bf16.mxu1 %v1055_v52  ;;  %vm323_vm5 = vcmask 195712   ;;  %vm330_vm6 = vcmask 261312   ;;  %vm337_vm7 = vcmask 326912  }
  0x3e   : > { %v1221_v9 = vld [vmem:[%s1189_s11 + $0x18] sm:$0xff]  ;;  %249 = vadd.xlane.f32.xlu1 %v248_v3  ;;  %v251_v10 = vadd.f32 %v1213_v6, %v1210_v5  ;;  %v1231_v13 = vld [vmem:[%s1189_s11 + $0xa8] sm:$0xff]  ;;  %v1234_v14 = vld [vmem:[%s1189_s11 + $0x20] sm:$0xff]  ;;  %vm344_vm8 = vcmask 392512   ;;  %vm351_vm9 = vcmask 458112   ;;  %vm358_vm10 = vcmask 523712  }
  0x3f   : > { %225 = vadd.xlane.f32.xlu0 %v224_v7  ;;  %v227_v11 = vadd.f32 %v1221_v9, %v1218_v8  ;;  %v1237_v15 = vld [vmem:[%s1189_s11 + $0x28] sm:$0xff]  ;;  %v254_v16 = vadd.f32 %v1231_v13, %v1228_v12  ;;  %v1244_v18 = vld [vmem:[%s1189_s11 + $0xb0] sm:$0xff]  ;;  %v1247_v19 = vld [vmem:[%s1189_s11 + $0xb8] sm:$0xff]  ;;  %vm399_vm11 = vcmask 1041409   ;;  %s1397_s6 = scalar_lea.vmem [#allocation5], %s820_s9  ;;  %s843_s9 = sshll.u32 %s1100_s16, 12 }
  0x40   : > { %v230_v17 = vadd.f32 %v1237_v15, %v1234_v14  ;;  %1527 = vst [vmem:[#allocation8_spill] sm:$0xff] %v1247_v19  ;;  %v1250_v20 = vld [vmem:[%s1189_s11 + $0x30] sm:$0xff]  ;;  %v1253_v21 = vld [vmem:[%s1189_s11 + $0x38] sm:$0xff]  ;;  %v257_v22 = vadd.f32 %v1247_v19, %v1244_v18  ;;  %v1260_v24 = vld [vmem:[%s1189_s11 + $0xc0] sm:$0xff]  ;;  %s739_s7 = sshll.u32 %s1397_s6, 4  ;;  %s1460_s19 = scalar_lea.hbm %s1513_s3, %s843_s9  ;;  %s1462_s7 = int_to_ptr.vmem [resolvable:$true] %s739_s7 }
  0x41   : > { %v233_v23 = vadd.f32 %v1253_v21, %v1250_v20  ;;  %v1263_v25 = vld [vmem:[%s1189_s11 + $0xc8] sm:$0xff]  ;;  %v1266_v26 = vld [vmem:[%s1189_s11 + $0x40] sm:$0xff]  ;;  %v1276_v30 = vld [vmem:[%s1189_s11 + $0xd0] sm:$0xff]  ;;  %s725_s16 = scalar_lea.sflag [#allocation4], %s1183_s5  ;;  %s982_s20 = scalar_lea.vmem %s1462_s7, 4096 }
  0x42   : > { %252 = vadd.xlane.f32.xlu1 %v251_v10  ;;  %v1269_v27 = vld [vmem:[%s1189_s11 + $0x48] sm:$0xff]  ;;  %v260_v28 = vadd.f32 %v1263_v25, %v1260_v24  ;;  %1528 = vst [vmem:[#allocation9_spill] sm:$0xff] %v1276_v30  ;;  %v1279_v31 = vld [vmem:[%s1189_s11 + $0xd8] sm:$0xff]  ;;  %v1282_v32 = vld [vmem:[%s1189_s11 + $0x50] sm:$0xff]  ;;  %p983_p6 = scmp.ne.s32.totalorder %s1462_s7, %s982_s20  ;;  %p1543_p11 = scmp.ne.s32.totalorder %s1524_s24, 0 }
  0x43   : > { %228 = vadd.xlane.f32.xlu0 %v227_v11  ;;  %v236_v29 = vadd.f32 %v1269_v27, %v1266_v26  ;;  %1529 = vst [vmem:[#allocation10_spill] sm:$0xff] %v1279_v31  ;;  %v1285_v33 = vld [vmem:[%s1189_s11 + $0x58] sm:$0xff]  ;;  %v263_v34 = vadd.f32 %v1279_v31, %v1276_v30  ;;  %v1292_v36 = vld [vmem:[%s1189_s11 + $0xe0] sm:$0xff]  ;;  %v1295_v37 = vld [vmem:[%s1189_s11 + $0xe8] sm:$0xff]  ;;  %s1056_s22 = smov [#allocation5]  }
  0x44   : > { %v239_v35 = vadd.f32 %v1285_v33, %v1282_v32  ;;  %1530 = vst [vmem:[#allocation11_spill] sm:$0xff] %v1292_v36  ;;  %1531 = vst [vmem:[#allocation12_spill] sm:$0xff] %v1295_v37  ;;  %v1298_v38 = vld [vmem:[%s1189_s11 + $0x60] sm:$0xff]  ;;  %v1301_v39 = vld [vmem:[%s1189_s11 + $0x68] sm:$0xff]  ;;  %v266_v40 = vadd.f32 %v1295_v37, %v1292_v36  ;;  %p984_p12 = pnand %p983_p6, %p1543_p11  ;;  %s986_s26 = sshll.u32 %s1056_s22, 4  ;;  %s987_s26 = int_to_ptr.vmem [resolvable:$false] %s986_s26 }
  0x45   : > { %v242_v41 = vadd.f32 %v1301_v39, %v1298_v38  ;;  %v1308_v42 = vld [vmem:[%s1189_s11 + $0xf0] sm:$0xff]  ;;  %v1311_v43 = vld [vmem:[%s1189_s11 + $0xf8] sm:$0xff]  ;;  %v288_v49 = vld [vmem:[%s1511_s1] sm:$0xf]  ;;  %s988_s27 = scalar_lea.vmem %s987_s26, 8192  ;;  %p989_p8 = scmp.lt.s32.totalorder %s1462_s7, %s987_s26 }
  0x46   : > { %255 = vadd.xlane.f32.xlu1 %v254_v16  ;;  %1532 = vst [vmem:[#allocation13_spill] sm:$0xff] %v1308_v42  ;;  %1533 = vst [vmem:[#allocation14_spill] sm:$0xff] %v1311_v43  ;;  %v1314_v44 = vld [vmem:[%s1189_s11 + $0x70] sm:$0xff]  ;;  %v1317_v45 = vld [vmem:[%s1189_s11 + $0x78] sm:$0xff]  ;;  %v269_v46 = vadd.f32 %v1311_v43, %v1308_v42  ;;  %856 = vmatpush3.xpose.msk.msra.mxu0 %vm401_vm0, %v288_v49  ;;  %v305_v16 = vlaneseq  ;;  %p985_p13 = pneg %p984_p12  ;;  %p990_p10 = scmp.lt.s32.totalorder %s988_s27, %s982_s20 }
  0x47   : > { %231 = vadd.xlane.f32.xlu0 %v230_v17  ;;  %v245_v47 = vadd.f32 %v1317_v45, %v1314_v44  ;;  %v478_v50 = vld [vmem:[%s1512_s2] sm:$0xff]  ;;  %v479_v51 = vld [vmem:[%s1512_s2 + $0x8] sm:$0xff]  ;;  %vm1335_vm3 = vmpackc.low %vm486_vm2, %vm486_vm2 }
  0x48   : > { %v880_v53 = vpack.c.bf16 %v479_v51, %v478_v50  ;;  %v480_v55 = vld [vmem:[%s1512_s2 + $0x10] sm:$0xff]  ;;  %v481_v56 = vld [vmem:[%s1512_s2 + $0x18] sm:$0xff]  ;;  %v482_v58 = vld [vmem:[%s1512_s2 + $0x20] sm:$0xff]  ;;  %p991_p0 = por %p990_p10, %p989_p8 }
  0x49   : > { %v884_v57 = vpack.c.bf16 %v481_v56, %v480_v55  ;;  %v483_v59 = vld [vmem:[%s1512_s2 + $0x28] sm:$0xff]  ;;  %v484_v61 = vld [vmem:[%s1512_s2 + $0x30] sm:$0xff]  ;;  %v485_v62 = vld [vmem:[%s1512_s2 + $0x38] sm:$0xff] }
  0x4a   : > { %258 = vadd.xlane.f32.xlu1 %v257_v22  ;;  %882 = vmatpush3.bf16.xpose.msk.msra.mxu1 %vm1335_vm3, %v880_v53  ;;  %v888_v60 = vpack.c.bf16 %v483_v59, %v482_v58  ;;  %v892_v63 = vpack.c.bf16 %v485_v62, %v484_v61  ;;  %p992_p2 = pnand %p991_p0, %p985_p13 }
  0x4b   : > { %234 = vadd.xlane.f32.xlu0 %v233_v23  ;;  %883 = vmatprep.subr.bf16.mxu1 %v1055_v52  ;;  %v306_v23 = vand.u32 127, %v305_v16 }
  0x4d   : > { %v339_v48 = vadd.s32 4294967256, %v306_v23  ;;  %v346_v53 = vadd.s32 4294967248, %v306_v23 }
  0x4e   : > { %261 = vadd.xlane.f32.xlu1 %v260_v28 }
  0x4f   : > { %237 = vadd.xlane.f32.xlu0 %v236_v29  ;;  %v1365_v29 = vshrl.u32 %v305_v16, 7 }
  0x51   : > { %v309_v49 = vsub.s32 %v306_v23, %v1365_v29  ;;  %v342_v59 = vsub.s32 %v339_v48, %v1365_v29 }
  0x52   : > { %264 = vadd.xlane.f32.xlu1 %v263_v34  ;;  %886 = vmatpush3.bf16.xpose.msk.msra.mxu1 %vm1335_vm3, %v884_v57 }
  0x53   : > { %240 = vadd.xlane.f32.xlu0 %v239_v35  ;;  %887 = vmatprep.subr.bf16.mxu1 %v1055_v52  ;;  %v311_v35 = vadd.s32 4294967288, %v306_v23 }
  0x55   : > { %v314_v51 = vsub.s32 %v311_v35, %v1365_v29 }
  0x56   : > { %267 = vadd.xlane.f32.xlu1 %v266_v40  ;;  %v318_v40 = vadd.s32 4294967280, %v306_v23 }
  0x57   : > { %243 = vadd.xlane.f32.xlu0 %v242_v41  ;;  %v325_v41 = vadd.s32 4294967272, %v306_v23 }
  0x59   : > { %v328_v55 = vsub.s32 %v325_v41, %v1365_v29 }
  0x5a   : > { %270 = vadd.xlane.f32.xlu1 %v269_v46  ;;  %890 = vmatpush3.bf16.xpose.msk.msra.mxu1 %vm1335_vm3, %v888_v60  ;;  %v332_v46 = vadd.s32 4294967264, %v306_v23 }
  0x5b   : > { %246 = vadd.xlane.f32.xlu0 %v245_v47  ;;  %891 = vmatprep.subr.bf16.mxu1 %v1055_v52  ;;  %v321_v52 = vsub.s32 %v318_v40, %v1365_v29 }
  0x5c   : > { %v335_v56 = vsub.s32 %v332_v46, %v1365_v29  ;;  %v353_v46 = vadd.s32 4294967240, %v306_v23 }
  0x5e   : > { %v356_v23 = vsub.s32 %v353_v46, %v1365_v29 }
  0x62   : > { %894 = vmatpush3.bf16.xpose.msk.msra.mxu1 %vm1335_vm3, %v892_v63 }
  0xcb   : > { %v250_v3 = vpop.xlane.xlu1 %249 }
  0xcc   : > { %v226_v7 = vpop.xlane.xlu0 %225  ;;  %v280_v61 = vmul.f32 0.00390625, %v250_v3 }
  0xcd   : > { %v272_v35 = vmul.f32 0.00390625, %v226_v7 }
  0xce   : > { %v363_v37 = vrot.slane %v280_v61, %v309_v49 }
  0xcf   : > { %v253_v10 = vpop.xlane.xlu1 %252  ;;  %v310_v19 = vrot.slane %v272_v35, %v309_v49 }
  0xd0   : > { %v229_v11 = vpop.xlane.xlu0 %228  ;;  %v281_v54 = vmul.f32 0.00390625, %v253_v10  ;;  %v349_v10 = vsub.s32 %v346_v53, %v1365_v29 }
  0xd1   : > { %v273_v57 = vmul.f32 0.00390625, %v229_v11 }
  0xd2   : > { %v367_v41 = vrot.slane %v281_v54, %v314_v51 }
  0xd3   : > { %v256_v17 = vpop.xlane.xlu1 %255  ;;  %v315_v11 = vrot.slane %v273_v57, %v314_v51 }
  0xd4   : > { %v232_v22 = vpop.xlane.xlu0 %231  ;;  %v282_v58 = vmul.f32 0.00390625, %v256_v17  ;;  %v368_v53 = vsel %vm316_vm4, %v367_v41, %v363_v37 }
  0xd5   : > { %v274_v62 = vmul.f32 0.00390625, %v232_v22  ;;  %v317_v51 = vsel %vm316_vm4, %v315_v11, %v310_v19 }
  0xd6   : > { %v372_v17 = vrot.slane %v282_v58, %v321_v52 }
  0xd7   : > { %v259_v28 = vpop.xlane.xlu1 %258  ;;  %v322_v3 = vrot.slane %v274_v62, %v321_v52 }
  0xd8   : > { %v235_v34 = vpop.xlane.xlu0 %234  ;;  %v283_v63 = vmul.f32 0.00390625, %v259_v28  ;;  %v373_v57 = vsel %vm323_vm5, %v372_v17, %v368_v53  ;;  %v627_v53 = vsub.s32 1, %v1365_v29 }
  0xd9   : > { %v275_v40 = vmul.f32 0.00390625, %v235_v34  ;;  %v324_v61 = vsel %vm323_vm5, %v322_v3, %v317_v51 }
  0xda   : > { %v377_v22 = vrot.slane %v283_v63, %v328_v55 }
  0xdb   : > { %v262_v47 = vpop.xlane.xlu1 %261  ;;  %v329_v7 = vrot.slane %v275_v40, %v328_v55 }
  0xdc   : > { %v238_v50 = vpop.xlane.xlu0 %237  ;;  %v284_v43 = vmul.f32 0.00390625, %v262_v47  ;;  %v378_v49 = vsel %vm330_vm6, %v377_v22, %v373_v57 }
  0xdd   : > { %v276_v42 = vmul.f32 0.00390625, %v238_v50  ;;  %v331_v37 = vsel %vm330_vm6, %v329_v7, %v324_v61  ;;  %v592_v7 = vsub.s32 0, %v1365_v29 }
  0xde   : > { %v382_v34 = vrot.slane %v284_v43, %v335_v56 }
  0xdf   : > { %v265_v60 = vpop.xlane.xlu1 %264  ;;  %v336_v54 = vrot.slane %v276_v42, %v335_v56 }
  0xe0   : > { %v241_v16 = vpop.xlane.xlu0 %240  ;;  %v285_v31 = vmul.f32 0.00390625, %v265_v60 }
  0xe1   : > { %v277_v30 = vmul.f32 0.00390625, %v241_v16  ;;  %v338_v19 = vsel %vm337_vm7, %v336_v54, %v331_v37 }
  0xe2   : > { %v387_v50 = vrot.slane %v285_v31, %v342_v59  ;;  %v383_v31 = vsel %vm337_vm7, %v382_v34, %v378_v49 }
  0xe3   : > { %v268_v48 = vpop.xlane.xlu1 %267  ;;  %v343_v58 = vrot.slane %v277_v30, %v342_v59 }
  0xe4   : > { %v286_v28 = vmul.f32 0.00390625, %v268_v48  ;;  %v244_v36 = vpop.xlane.xlu0 %243  ;;  %v388_v56 = vsel %vm344_vm8, %v387_v50, %v383_v31 }
  0xe5   : > { %v278_v47 = vmul.f32 0.00390625, %v244_v36  ;;  %v345_v59 = vsel %vm344_vm8, %v343_v58, %v338_v19 }
  0xe6   : > { %v392_v60 = vrot.slane %v286_v28, %v349_v10 }
  0xe7   : > { %v271_v52 = vpop.xlane.xlu1 %270  ;;  %v350_v55 = vrot.slane %v278_v47, %v349_v10 }
  0xe8   : > { %v287_v43 = vmul.f32 0.00390625, %v271_v52  ;;  %v247_v36 = vpop.xlane.xlu0 %246  ;;  %v393_v62 = vsel %vm351_vm9, %v392_v60, %v388_v56 }
  0xe9   : > { %v279_v42 = vmul.f32 0.00390625, %v247_v36  ;;  %v352_v16 = vsel %vm351_vm9, %v350_v55, %v345_v59 }
  0xea   : > { %v397_v30 = vrot.slane %v287_v43, %v356_v23 }
  0xeb   : > { %v357_v63 = vrot.slane %v279_v42, %v356_v23 }
  0xec   : > { %v398_v35 = vsel %vm358_vm10, %v397_v30, %v393_v62  ;;  %v1536_v30 = vld [vmem:[#allocation8_spill] sm:$0xff] }
  0xed   : > { %v359_v40 = vsel %vm358_vm10, %v357_v63, %v352_v16  ;;  %v1538_v63 = vld [vmem:[#allocation12_spill] sm:$0xff]  ;;  %v1539_v16 = vld [vmem:[#allocation9_spill] sm:$0xff] }
  0xee   : > { %v400_v10 = vsel %vm399_vm11, %v398_v35, %v359_v40  ;;  %v1540_v40 = vld [vmem:[#allocation10_spill] sm:$0xff] }
  0xef   : > { %858 = vmatmul.mubr.msk.f32.vlgmr.msra.gmra.mrb[0].mxu0 %vm401_vm0, %v400_v10 }
 0x1c2   : > { %v473_v41 = vpop.f32.mrb[0].mxu0 }
 0x1c3   : > { %v477_v46 = vmax.f32 %v473_v41, 0.0  ;;  %v859_v11 = vpop.f32.mrb[1].mxu0  ;;  %v1541_v41 = vld [vmem:[#allocation13_spill] sm:$0xff] }
 0x1c4   : > { %v1542_v11 = vld [vmem:[#allocation14_spill] sm:$0xff] }
 0x1c5   : > { %877 = vmatmul.mubr.msk.f32.vlgmr.msra.gmra.mrb[0].mxu1 %vm486_vm2, %v477_v46 }
 0x298   : > { %v580_v17 = vpop.f32.mrb[0].mxu1 }
 0x299   : > { %v833_v48 = vmul.f32 -1.442695, %v580_v17  ;;  %v878_v3 = vpop.f32.mrb[1].mxu1 }
 0x29b   : > { %948 = vpow2.f32 %v833_v48 }
 0x2a5   : > { %v949_v22 = vpop.eup %948 }
 0x2a6   : > { %v587_v28 = vadd.f32 1.0, %v949_v22 }
 0x2a8   : > { %950 = vrcp.f32 %v587_v28 }
 0x2b2   : > { %v951_v34 = vpop.eup %950 }
 0x2b3   : > { %v593_v47 = vrot.slane %v951_v34, %v592_v7  ;;  %v628_v54 = vrot.slane %v951_v34, %v627_v53 }
 0x2b5   : > { %599 = vbcast.lane.b32.xlu1 %v593_v47, 264  ;;  %595 = vbcast.lane.b32.xlu0 %v593_v47, 256 }
 0x2b9   : > { %603 = vbcast.lane.b32.xlu1 %v593_v47, 272  ;;  %611 = vbcast.lane.b32.xlu0 %v593_v47, 288 }
 0x2bd   : > { %607 = vbcast.lane.b32.xlu1 %v593_v47, 280  ;;  %619 = vbcast.lane.b32.xlu0 %v593_v47, 304 }
 0x2c1   : > { %615 = vbcast.lane.b32.xlu1 %v593_v47, 296  ;;  %630 = vbcast.lane.b32.xlu0 %v628_v54, 256 }
 0x2c5   : > { %623 = vbcast.lane.b32.xlu1 %v593_v47, 312  ;;  %638 = vbcast.lane.b32.xlu0 %v628_v54, 272 }
 0x2c9   : > { %634 = vbcast.lane.b32.xlu1 %v628_v54, 264  ;;  %646 = vbcast.lane.b32.xlu0 %v628_v54, 288 }
 0x2cd   : > { %642 = vbcast.lane.b32.xlu1 %v628_v54, 280  ;;  %654 = vbcast.lane.b32.xlu0 %v628_v54, 304 }
 0x2d1   : > { %650 = vbcast.lane.b32.xlu1 %v628_v54, 296 }
 0x2d5   : > { %658 = vbcast.lane.b32.xlu1 %v628_v54, 312 }
 0x327   : > { %v600_v50 = vpop.permute.xlu1 %599  ;;  %v596_v23 = vpop.permute.xlu0 %595 }
 0x328   : > { %v662_v51 = vmul.f32 %v600_v50, %v1218_v8  ;;  %v663_v29 = vmul.f32 %v600_v50, %v1221_v9  ;;  %v660_v57 = vmul.f32 %v596_v23, %v1202_v2  ;;  %v661_v58 = vmul.f32 %v596_v23, %v1207_v4 }
 0x32a   : > { %694 = vst [vmem:[%s1397_s6 + $0x10] sm:$0xff] %v662_v51  ;;  %695 = vst [vmem:[%s1397_s6 + $0x18] sm:$0xff] %v663_v29 }
 0x32b   : > { %692 = vst [vmem:[%s1397_s6] sm:$0xff] %v660_v57  ;;  %693 = vst [vmem:[%s1397_s6 + $0x8] sm:$0xff] %v661_v58  ;;  %v604_v8 = vpop.permute.xlu1 %603  ;;  %v612_v2 = vpop.permute.xlu0 %611 }
 0x32c   : > { %v664_v4 = vmul.f32 %v604_v8, %v1234_v14  ;;  %v665_v9 = vmul.f32 %v604_v8, %v1237_v15  ;;  %v668_v60 = vmul.f32 %v612_v2, %v1266_v26  ;;  %v669_v52 = vmul.f32 %v612_v2, %v1269_v27 }
 0x32e   : > { %696 = vst [vmem:[%s1397_s6 + $0x20] sm:$0xff] %v664_v4  ;;  %697 = vst [vmem:[%s1397_s6 + $0x28] sm:$0xff] %v665_v9 }
 0x32f   : > { %700 = vst [vmem:[%s1397_s6 + $0x40] sm:$0xff] %v668_v60  ;;  %701 = vst [vmem:[%s1397_s6 + $0x48] sm:$0xff] %v669_v52  ;;  %v608_v61 = vpop.permute.xlu1 %607  ;;  %v620_v49 = vpop.permute.xlu0 %619 }
 0x330   : > { %v666_v55 = vmul.f32 %v608_v61, %v1250_v20  ;;  %v667_v14 = vmul.f32 %v608_v61, %v1253_v21  ;;  %v672_v15 = vmul.f32 %v620_v49, %v1298_v38  ;;  %v673_v26 = vmul.f32 %v620_v49, %v1301_v39 }
 0x332   : > { %698 = vst [vmem:[%s1397_s6 + $0x30] sm:$0xff] %v666_v55  ;;  %699 = vst [vmem:[%s1397_s6 + $0x38] sm:$0xff] %v667_v14 }
 0x333   : > { %704 = vst [vmem:[%s1397_s6 + $0x60] sm:$0xff] %v672_v15  ;;  %705 = vst [vmem:[%s1397_s6 + $0x68] sm:$0xff] %v673_v26  ;;  %v616_v27 = vpop.permute.xlu1 %615  ;;  %v631_v43 = vpop.permute.xlu0 %630 }
 0x334   : > { %v670_v36 = vmul.f32 %v616_v27, %v1282_v32  ;;  %v671_v20 = vmul.f32 %v616_v27, %v1285_v33  ;;  %v676_v21 = vmul.f32 %v631_v43, %v1196_v0  ;;  %v677_v38 = vmul.f32 %v631_v43, %v1199_v1 }
 0x336   : > { %702 = vst [vmem:[%s1397_s6 + $0x50] sm:$0xff] %v670_v36  ;;  %703 = vst [vmem:[%s1397_s6 + $0x58] sm:$0xff] %v671_v20 }
 0x337   : > { %708 = vst [vmem:[%s1397_s6 + $0x80] sm:$0xff] %v676_v21  ;;  %709 = vst [vmem:[%s1397_s6 + $0x88] sm:$0xff] %v677_v38  ;;  %v624_v39 = vpop.permute.xlu1 %623  ;;  %v639_v37 = vpop.permute.xlu0 %638 }
 0x338   : > { %v674_v31 = vmul.f32 %v624_v39, %v1314_v44  ;;  %v675_v32 = vmul.f32 %v624_v39, %v1317_v45  ;;  %v680_v33 = vmul.f32 %v639_v37, %v1228_v12  ;;  %v681_v0 = vmul.f32 %v639_v37, %v1231_v13 }
 0x33a   : > { %706 = vst [vmem:[%s1397_s6 + $0x70] sm:$0xff] %v674_v31  ;;  %707 = vst [vmem:[%s1397_s6 + $0x78] sm:$0xff] %v675_v32 }
 0x33b   : > { %712 = vst [vmem:[%s1397_s6 + $0xa0] sm:$0xff] %v680_v33  ;;  %713 = vst [vmem:[%s1397_s6 + $0xa8] sm:$0xff] %v681_v0  ;;  %v635_v1 = vpop.permute.xlu1 %634  ;;  %v647_v42 = vpop.permute.xlu0 %646 }
 0x33c   : > { %v678_v19 = vmul.f32 %v635_v1, %v1210_v5  ;;  %v679_v44 = vmul.f32 %v635_v1, %v1213_v6  ;;  %v684_v45 = vmul.f32 %v647_v42, %v1260_v24  ;;  %v685_v12 = vmul.f32 %v647_v42, %v1263_v25  ;;  %v1537_v6 = vld [vmem:[#allocation11_spill] sm:$0xff] }
 0x33e   : > { %710 = vst [vmem:[%s1397_s6 + $0x90] sm:$0xff] %v678_v19  ;;  %711 = vst [vmem:[%s1397_s6 + $0x98] sm:$0xff] %v679_v44 }
 0x33f   : > { %716 = vst [vmem:[%s1397_s6 + $0xc0] sm:$0xff] %v684_v45  ;;  %717 = vst [vmem:[%s1397_s6 + $0xc8] sm:$0xff] %v685_v12  ;;  %v643_v13 = vpop.permute.xlu1 %642  ;;  %v655_v56 = vpop.permute.xlu0 %654 }
 0x340   : > { %v682_v5 = vmul.f32 %v643_v13, %v1244_v18  ;;  %v683_v59 = vmul.f32 %v643_v13, %v1536_v30  ;;  %v688_v62 = vmul.f32 %v655_v56, %v1537_v6  ;;  %v689_v24 = vmul.f32 %v655_v56, %v1538_v63 }
 0x342   : > { %714 = vst [vmem:[%s1397_s6 + $0xb0] sm:$0xff] %v682_v5  ;;  %715 = vst [vmem:[%s1397_s6 + $0xb8] sm:$0xff] %v683_v59 }
 0x343   : > { %720 = vst [vmem:[%s1397_s6 + $0xe0] sm:$0xff] %v688_v62  ;;  %721 = vst [vmem:[%s1397_s6 + $0xe8] sm:$0xff] %v689_v24  ;;  %v651_v25 = vpop.permute.xlu1 %650 }
 0x344   : > { %v686_v35 = vmul.f32 %v651_v25, %v1539_v16  ;;  %v687_v10 = vmul.f32 %v651_v25, %v1540_v40 }
 0x346   : > { %718 = vst [vmem:[%s1397_s6 + $0xd0] sm:$0xff] %v686_v35  ;;  %719 = vst [vmem:[%s1397_s6 + $0xd8] sm:$0xff] %v687_v10 }
 0x347   : > { %v659_v18 = vpop.permute.xlu1 %658 }
 0x348   : > { %v690_v46 = vmul.f32 %v659_v18, %v1541_v41  ;;  %v691_v17 = vmul.f32 %v659_v18, %v1542_v11 }
 0x34a   : > { %722 = vst [vmem:[%s1397_s6 + $0xf0] sm:$0xff] %v690_v46  ;;  %723 = vst [vmem:[%s1397_s6 + $0xf8] sm:$0xff] %v691_v17 }
 0x34b   : > { %995 = shalt.err (!%p992_p2)
}
 0x34c   : > { %s996_s28 = scalar_lea.hbm %s1460_s19, 4096  ;;  %s1000_s10 = scalar_lea.hbm %s1513_s3, 8192 }
 0x34d   : > { %p997_p4 = scmp.ne.s32.totalorder %s1460_s19, %s996_s28  ;;  %p1001_p9 = scmp.lt.u32.totalorder %s1460_s19, %s1513_s3 }
 0x34e   : > { %p1002_p1 = scmp.lt.u32.totalorder %s1000_s10, %s996_s28  ;;  %p1004_p6 = scmp.lt.u32.totalorder %s996_s28, %s1460_s19 }
 0x34f   : > { %p998_p5 = pnand %p997_p4, %p1543_p11 }
 0x350   : > { %p1003_p3 = por %p1002_p1, %p1001_p9 }
 0x351   : > { %p999_p7 = pneg %p998_p5 }
 0x352   : > { %p1005_p12 = por %p1004_p6, %p1003_p3 }
 0x354   : > { %p1006_p13 = pnand %p1005_p12, %p999_p7 }
 0x356   : > { %1009 = shalt.err (!%p1006_p13)
}
 0x357   : > { %s1057_s4 = smov 256   ;;  %s1058_s6 = smov 16  }
 0x358   : > { %897 = dma.vmem_to_hbm [thread:$0]  (%p1543_p11), %s1462_s7, 4096, %s1460_s19, %s725_s16, %s1057_s4, %s1057_s4, %s1058_s6  }
 0x359 PF: > { %s754_s9 = sand.u32 1, %s1036_s12   ;;  %p1544_p8 = scmp.ne.s32.totalorder %s1525_s25, 0 }
 0x35a   : > { %p1545_p10 = scmp.ge.s32.totalorder %s1048_s15, 2  ;;  %s755_s8 = scalar_lea.sflag [#allocation4], %s754_s9 }
 0x35c   : > { %p904_p0 = pnand %p1545_p10, %p1544_p8 }
 0x35e   : > { %1031 = dma.done.wait (!%p904_p0), %s755_s8, 4096  }
 0x35f   : > { %1033 = vsyncadd (!%p904_p0), %s755_s8, 4294963200  ;;  %p16_p2 = scmp.ge.s32.totalorder %s1104_s18, 4   ;;  %s1546_s12 = smov %s1040_s13 }
 0x360   : > { %s1547_s13 = smov %s1044_s14  ;;  %s1548_s14 = smov %s1116_s21 }
 0x361   : > { %s1549_s15 = smov %s1104_s18  ;;  %18 = sbr.rel (!%p16_p2) target bundleno = 5 (0x5), region = 77 }
 0x368   :  { %760 = vsyncpa [#allocation3], 1 }
 0x369   :  { %762 = vsyncpa [#allocation3 + $0x1], 1 }
 0x36a   :  { %763 = vsyncpa [#allocation4], 1 }
 0x36b   :  { %765 = vsyncpa [#allocation4 + $0x1], 1 }

</bundles_post_ra>
